<compile_context>
chip_gen: v5e
topology: v5e:2x2
jax: 0.10.0
libtpu: 0.0.40
codegen_flags: <defaults>
</compile_context>

<pallas_src>
import functools

import jax
import jax.numpy as jnp
from jax.experimental import pallas as pl
from jax.experimental.pallas import tpu as pltpu


def _volterra_kernel(w_ref, xT_ref, oT_ref):
    """Fused lane-dense Volterra tile: y^T = h1^T·x^T + h2^T·(x^T)^2.

    w_ref  : (2K, N) VMEM, grid-resident weights [h1; h2_diag].
    xT_ref : (K, TM) VMEM tile of x^T   (M on the 128-lane axis).
    oT_ref : (N, TM) VMEM tile of y^T   (lane-dense output stores).
    """
    K = xT_ref.shape[0]
    N = oT_ref.shape[0]

    x = xT_ref[...]                          # (K, TM) f32
    x2 = x * x                               # VPU
    w = w_ref[...]                           # (2K, N) f32, tiny

    # N is tiny (1 for this module): static unroll.  Per output column:
    # two lane-broadcast multiplies + add on the VPU, one cross-sublane
    # reduce on the XLU.  No MXU involvement.
    for n in range(N):
        h1_col = w[:K, n:n + 1]              # (K, 1) -> broadcast over lanes
        h2_col = w[K:, n:n + 1]              # (K, 1)
        acc = jnp.sum(h1_col * x + h2_col * x2, axis=0, keepdims=True)  # (1, TM)
        oT_ref[pl.ds(n, 1), :] = acc.astype(oT_ref.dtype)


def _round_up(a, b):
    return (a + b - 1) // b * b


def volterra_surrogate_forward(x, h1, h2_diag, *, block_m=1024):
    """x: (B, S, K) f32, h1/h2_diag: (K, N) f32 -> (B, S, N) f32."""
    B, S, K = x.shape
    Kw, N = h1.shape
    assert K == Kw and h2_diag.shape == (K, N)

    M = B * S
    # M tile on the lane axis: multiple of 128, capped at block_m.
    TM = min(_round_up(block_m, 128), _round_up(M, 128))
    M_pad = _round_up(M, TM)

    # Layout plumbing (XLA side, outside the kernel): transpose so M is the
    # lane (minor) axis, zero-pad M up to the tile multiple.
    xT = jnp.swapaxes(x.reshape(M, K), 0, 1)            # (K, M)
    if M_pad != M:
        xT = jnp.pad(xT, ((0, 0), (0, M_pad - M)))      # (K, M_pad)

    # Single fused weight operand, built once outside the hot path.
    w_cat = jnp.concatenate([h1, h2_diag], axis=0)      # (2K, N)

    flops = 4 * M * K * N                               # both fused "matmuls"
    bytes_accessed = 4 * (M * K + M * N + 2 * K * N)

    yT = pl.pallas_call(
        _volterra_kernel,
        out_shape=jax.ShapeDtypeStruct((N, M_pad), jnp.float32),
        grid_spec=pltpu.PrefetchScalarGridSpec(
            num_scalar_prefetch=0,
            grid=(M_pad // TM,),
            in_specs=[
                # Weights: constant block index -> stays VMEM-resident.
                pl.BlockSpec((2 * K, N), lambda i: (0, 0)),
                # x^T tiles streamed (double-buffered) along M.
                pl.BlockSpec((K, TM), lambda i: (0, i)),
            ],
            out_specs=pl.BlockSpec((N, TM), lambda i: (0, i)),
        ),
        compiler_params=pltpu.CompilerParams(
            dimension_semantics=("parallel",)),
        cost_estimate=pl.CostEstimate(
            flops=flops, transcendentals=0, bytes_accessed=bytes_accessed),
    )(w_cat, xT)

    # Undo layout plumbing: drop padding, transpose back, restore (B, S, N).
    return jnp.swapaxes(yT[:, :M], 0, 1).reshape(B, S, N)


def _reference(x, h1, h2_diag):
    B, S, K = x.shape
    x_flat = x.reshape(-1, K)
    return (x_flat @ h1 + (x_flat ** 2) @ h2_diag).reshape(B, S, -1)


if __name__ == "__main__":
    # Shapes implied by the module: input_size=10 (K), single regression
    # target (N=1); small batch/seq for the leading "view" dims.
    input_size = 10      # K
    output_size = 1      # N

    key = jax.random.PRNGKey(0)
    kx, k1, k2, kx2 = jax.random.split(key, 4)

    # Deterministic synthetic "coefficients" (stand-in for lin_reg_quad.coef_.T).
    h1 = jax.random.normal(k1, (input_size, output_size), dtype=jnp.float32)
    h2_diag = jax.random.normal(k2, (input_size, output_size), dtype=jnp.float32)

    # --- Test 1: tiny shape (single grid step, M padded to one 128 tile) ---
    B, S = 2, 8
    x = jax.random.normal(kx, (B, S, input_size), dtype=jnp.float32)
    fwd = jax.jit(volterra_surrogate_forward)
    y = jax.block_until_ready(fwd(x, h1, h2_diag))
    y_ref = _reference(x, h1, h2_diag)
    assert y.shape == (B, S, output_size)
    assert jnp.allclose(y, y_ref, atol=1e-5, rtol=1e-5)

    # --- Test 2: exercise the M grid / pipelining path (grid > 1) ---
    B2, S2 = 4, 96                                  # M = 384, block_m=128 -> 3 steps
    x2 = jax.random.normal(kx2, (B2, S2, input_size), dtype=jnp.float32)
    fwd_tiled = jax.jit(functools.partial(volterra_surrogate_forward, block_m=128))
    y2 = jax.block_until_ready(fwd_tiled(x2, h1, h2_diag))
    y2_ref = _reference(x2, h1, h2_diag)
    assert y2.shape == (B2, S2, output_size)
    assert jnp.allclose(y2, y2_ref, atol=1e-5, rtol=1e-5)

    print("KERNEL_OK")
</pallas_src>

<mosaic_0001>
module attributes {stable_mosaic.version = 11 : i64} {
  func.func @_volterra_kernel(%arg0: i32, %arg1: memref<20x1xf32, #tpu.memory_space<vmem>>, %arg2: memref<10x128xf32, #tpu.memory_space<vmem>>, %arg3: memref<1x128xf32, #tpu.memory_space<vmem>>) attributes {dimension_semantics = [#tpu.dimension_semantics<parallel>], iteration_bounds = array<i64: 1>, scalar_prefetch = 0 : i64, scratch_operands = 0 : i64, tpu.core_type = #tpu.core_type<tc>, window_params = [{pipeline_mode = #tpu.pipeline_mode<synchronous>, transform_indices = @transform_0, window_bounds = array<i64: 20, 1>}, {transform_indices = @transform_1, window_bounds = array<i64: 10, 128>}, {transform_indices = @transform_2, window_bounds = array<i64: 1, 128>}]} {
    %c0 = arith.constant 0 : index
    %c0_0 = arith.constant 0 : index
    %0 = vector.load %arg2[%c0, %c0_0] : memref<10x128xf32, #tpu.memory_space<vmem>>, vector<10x128xf32>
    %1 = arith.mulf %0, %0 : vector<10x128xf32>
    %c0_1 = arith.constant 0 : index
    %c0_2 = arith.constant 0 : index
    %2 = vector.load %arg1[%c0_1, %c0_2] : memref<20x1xf32, #tpu.memory_space<vmem>>, vector<20x1xf32>
    %3 = vector.extract_strided_slice %2 {offsets = [0, 0], sizes = [10, 1], strides = [1, 1]} : vector<20x1xf32> to vector<10x1xf32>
    %4 = vector.extract_strided_slice %2 {offsets = [10, 0], sizes = [10, 1], strides = [1, 1]} : vector<20x1xf32> to vector<10x1xf32>
    %5 = vector.broadcast %3 : vector<10x1xf32> to vector<10x128xf32>
    %6 = arith.mulf %5, %0 : vector<10x128xf32>
    %7 = vector.broadcast %4 : vector<10x1xf32> to vector<10x128xf32>
    %8 = arith.mulf %7, %1 : vector<10x128xf32>
    %9 = arith.addf %6, %8 : vector<10x128xf32>
    %cst = arith.constant dense<0.000000e+00> : vector<128xf32>
    %10 = vector.multi_reduction <add>, %9, %cst [0] : vector<10x128xf32> to vector<128xf32>
    %11 = vector.shape_cast %10 : vector<128xf32> to vector<1x128xf32>
    %c0_3 = arith.constant 0 : index
    %c0_4 = arith.constant 0 : index
    %12 = vector.load %arg3[%c0_3, %c0_4] : memref<1x128xf32, #tpu.memory_space<vmem>>, vector<1x128xf32>
    tpu.vector_store %arg3[%c0_3, %c0_4], %11 {strides = array<i32>} : memref<1x128xf32, #tpu.memory_space<vmem>>, vector<1x128xf32>,
    return
  }
  func.func @transform_0(%arg0: i32) -> (i32, i32) {
    %c0_i32 = arith.constant 0 : i32
    %c0_i32_0 = arith.constant 0 : i32
    %c0_i32_1 = arith.constant 0 : i32
    return %c0_i32, %c0_i32_0 : i32, i32
  }
  func.func @transform_1(%arg0: i32) -> (i32, i32) {
    %c0_i32 = arith.constant 0 : i32
    %c0_i32_0 = arith.constant 0 : i32
    return %c0_i32, %arg0 : i32, i32
  }
  func.func @transform_2(%arg0: i32) -> (i32, i32) {
    %c0_i32 = arith.constant 0 : i32
    %c0_i32_0 = arith.constant 0 : i32
    return %c0_i32, %arg0 : i32, i32
  }
}

</mosaic_0001>

<bundles_post_ra>
// kernel: volterra_surrogate_forward.1
= control target key start
LH: loop header
LB: loop body
LE: loop exit
PB: predicated region body
PF: predicated region fallthrough
CT: control target
= control target key end

     0   :  { %v71_v0 = vmov 0   ;;  %vm37_vm0 = vcmask 1041408   ;;  %vm47_vm1 = vcmask 1045504   ;;  %s105_s0 = inlined_call_operand.vmem [shape: f32[20,1], index: 0, kind: input, shape index: {}]   ;;  %s106_s1 = inlined_call_operand.vmem [shape: f32[10,128], index: 1, kind: input, shape index: {}]   ;;  %s107_s2 = inlined_call_operand.vmem [shape: f32[1,128], index: 2, kind: output, shape index: {}]  }
   0x1   :  { %69 = vset.pattern.permute.xlu0 %v71_v0  ;;  %v16_v1 = vld [vmem:[%s105_s0 + $0x8] sm:$0xff]  ;;  %70 = vset.pattern.permute.xlu1 %v71_v0  ;;  %v15_v2 = vld [vmem:[%s105_s0] sm:$0xff]  ;;  %v17_v3 = vld [vmem:[%s105_s0 + $0x10] sm:$0xf] }
   0x2   :  { %25 = vperm.xlu0 %69, %v16_v1   ;;  %20 = vperm.xlu1 %70, %v15_v2   ;;  %v11_v4 = vld [vmem:[%s106_s1] sm:$0xff]  ;;  %v12_v5 = vld [vmem:[%s106_s1 + $0x8] sm:$0x3] }
   0x3   :  { %v14_v6 = vmul.f32 %v12_v5, %v12_v5  ;;  %v13_v7 = vmul.f32 %v11_v4, %v11_v4 }
   0x5   :  { %v39_v9 = vrot.slane %v14_v6, 6  ;;  %v38_v10 = vrot.slane %v13_v7, 6 }
   0x7   :  { %v40_v11 = vsel %vm37_vm0, %v38_v10, %v39_v9 }
   0xa   :  { %32 = vperm.xlu0 %69, %v17_v3  }
  0x74   :  { %v26_v8 = vpop.permute.xlu0 %25  ;;  %v21_v13 = vpop.permute.xlu1 %20 }
  0x75   :  { %v43_v12 = vmul.f32 %v38_v10, %v26_v8  ;;  %v28_v16 = vmul.f32 %v21_v13, %v11_v4  ;;  %v29_v17 = vmul.f32 %v26_v8, %v12_v5 }
  0x77   :  { %v48_v18 = vrot.slane %v43_v12, 2 }
  0x7c   :  { %v33_v14 = vpop.permute.xlu0 %32 }
  0x7d   :  { %v44_v15 = vmul.f32 %v40_v11, %v33_v14 }
  0x7f   :  { %v49_v19 = vrot.slane %v44_v15, 2 }
  0x81   :  { %v54_v20 = vadd.f32 %v49_v19, %v29_v17  ;;  %v50_v21 = vsel %vm47_vm1, %v48_v18, %v49_v19 }
  0x82   :  { %v53_v22 = vadd.f32 %v50_v21, %v28_v16 }
  0x83   :  { %v55_v23 = vsel %vm37_vm0, %v54_v20, 0.0 }
  0x84   :  { %v56_v24 = vadd.f32 %v55_v23, %v53_v22 }
  0x86   :  { %v57_v25 = vrot.slane %v56_v24, 4 }
  0x88   :  { %v58_v26 = vadd.f32 %v57_v25, %v56_v24 }
  0x8a   :  { %v59_v27 = vrot.slane %v58_v26, 2 }
  0x8c   :  { %v60_v28 = vadd.f32 %v59_v27, %v58_v26 }
  0x8e   :  { %v61_v29 = vrot.slane %v60_v28, 1 }
  0x90   :  { %v62_v30 = vadd.f32 %v61_v29, %v60_v28 }
  0x92   :  { %63 = vst [vmem:[%s107_s2] sm:$0x1] %v62_v30 }

</bundles_post_ra>
